<compile_context>
chip_gen: v6e
topology: v6e:2x2x1
jax: 0.10.0
libtpu: 0.0.40
codegen_flags: <defaults>
</compile_context>

<pallas_src>
import jax
import jax.numpy as jnp
from jax import lax
from jax.experimental import pallas as pl
from jax.experimental.pallas import tpu as pltpu

BATCH = 8
S_DIM = 32            # state feature dim
A_DIM = 16            # action feature dim
HID = 32              # hidden width
OUT = 1               # critic value
IN_DIM = S_DIM + A_DIM            # 48
W_ROWS = IN_DIM + 3 * HID         # 144 packed weight-slab rows (all dense)
B_ROWS = 8                        # bias / final-weight-row slab sublanes


def _round_up(x, m):
    return ((x + m - 1) // m) * m


def critic_kernel(s_ref, a_ref, w_ref, b_ref, out_ref):
    f32 = jnp.float32
    s = s_ref[...]                                             # [tb, 32]
    a = a_ref[...]                                             # [tb, 16]

    # State branch: Linear -> ReLU -> Linear -> ReLU
    hs = jnp.dot(s, w_ref[0:S_DIM, :], preferred_element_type=f32)
    hs = jnp.maximum(hs + b_ref[0:1, :], 0.0)
    hs = jnp.dot(hs, w_ref[IN_DIM:IN_DIM + HID, :], preferred_element_type=f32)
    hs = jnp.maximum(hs + b_ref[2:3, :], 0.0)                  # [tb, 32]

    # Action branch: Linear -> ReLU -> Linear -> ReLU
    ha = jnp.dot(a, w_ref[S_DIM:IN_DIM, :], preferred_element_type=f32)
    ha = jnp.maximum(ha + b_ref[1:2, :], 0.0)
    ha = jnp.dot(ha, w_ref[IN_DIM + HID:IN_DIM + 2 * HID, :],
                 preferred_element_type=f32)
    ha = jnp.maximum(ha + b_ref[3:4, :], 0.0)                  # [tb, 32]

    # Merge + output Linear -> ReLU
    x = hs + ha
    x = jnp.dot(x, w_ref[IN_DIM + 2 * HID:W_ROWS, :],
                preferred_element_type=f32)
    x = jnp.maximum(x + b_ref[4:5, :], 0.0)                    # [tb, 32]

    # Final Linear(HID, 1) as a lane-dense [1, tb] row: contract the HID axis
    # of [1, HID] x [tb, HID] on the MXU (idle at this point anyway); avoids a
    # (tb, 1) masked-store column writeback.
    w_row = b_ref[5:6, :]                                      # [1, 32]
    v = lax.dot_general(w_row, x, (((1,), (1,)), ((), ())),
                        preferred_element_type=f32)            # [1, tb]
    out_ref[...] = (v + b_ref[6:7, 0:1]).astype(out_ref.dtype)


def pack_params(params):
    """Pack the 12 raw tensors into one dense weight slab [144, 32] and one
    bias / final-row slab [8, 32]."""
    (wa0, ba0, wa1, ba1, ws0, bs0, ws1, bs1, wo0, bo0, wo1, bo1) = params
    f32 = jnp.float32
    # Row layout: [ws0 | wa0 | ws1 | wa1 | wo0]
    w_slab = jnp.concatenate([ws0, wa0, ws1, wa1, wo0], axis=0).astype(f32)

    b_slab = jnp.zeros((B_ROWS, HID), f32)
    b_slab = b_slab.at[0, :].set(bs0[0])        # state  layer0 bias
    b_slab = b_slab.at[1, :].set(ba0[0])        # action layer0 bias
    b_slab = b_slab.at[2, :].set(bs1[0])        # state  layer1 bias
    b_slab = b_slab.at[3, :].set(ba1[0])        # action layer1 bias
    b_slab = b_slab.at[4, :].set(bo0[0])        # output layer0 bias
    b_slab = b_slab.at[5, :].set(wo1[:, 0])     # final weight row [HID]
    b_slab = b_slab.at[6, 0].set(bo1[0, 0])     # final bias scalar
    return w_slab, b_slab


def _choose_batch_tile(B, batch_tile):
    """Large tiles amortize the ~0.35us/grid-step overhead; for big batches the
    tile is capped at ceil(B/2) so the "parallel" axis has >= 2 steps and can
    shard across v7x's two TensorCores."""
    if B >= 256:
        tb = min(batch_tile, _round_up(-(-B // 2), 8))
    else:
        tb = min(batch_tile, _round_up(B, 8))
    return max(tb, 8)


def ac_critic_forward(state, action, packed, batch_tile=1024):
    """state: [B, S_DIM], action: [B, A_DIM]  ->  value: [B, 1]"""
    w_slab, b_slab = packed
    B = state.shape[0]
    state = state.astype(jnp.float32)
    action = action.astype(jnp.float32)

    tb = _choose_batch_tile(B, batch_tile)
    num_tiles = pl.cdiv(B, tb)
    # No input padding: if B % tb != 0 the ragged last block reads Pallas edge
    # padding; rows are independent and the tail outputs are sliced off below.

    out = pl.pallas_call(
        critic_kernel,
        out_shape=jax.ShapeDtypeStruct((num_tiles, tb), jnp.float32),
        grid=(num_tiles,),
        in_specs=[
            pl.BlockSpec((tb, S_DIM), lambda i: (i, 0)),
            pl.BlockSpec((tb, A_DIM), lambda i: (i, 0)),
            pl.BlockSpec((W_ROWS, HID), lambda i: (0, 0)),   # resident slab
            pl.BlockSpec((B_ROWS, HID), lambda i: (0, 0)),   # resident slab
        ],
        out_specs=pl.BlockSpec((1, tb), lambda i: (i, 0)),   # lane-dense row
        compiler_params=pltpu.CompilerParams(
            dimension_semantics=("parallel",)),
    )(state, action, w_slab, b_slab)

    # (num_tiles, tb) row-major == batch order; drop ragged-tail rows.
    return out.reshape(-1, OUT)[:B]


def init_params(key):
    """Deterministic init mimicking torch.nn.Linear default (uniform +/- 1/sqrt(fan_in)).
    Weights stored as [in, out] (transposed relative to torch's [out, in])."""
    def linear_init(k, fan_in, fan_out):
        kw, kb = jax.random.split(k)
        bound = 1.0 / jnp.sqrt(fan_in)
        w = jax.random.uniform(kw, (fan_in, fan_out), jnp.float32, -bound, bound)
        b = jax.random.uniform(kb, (1, fan_out), jnp.float32, -bound, bound)
        return w, b

    keys = jax.random.split(key, 6)
    wa0, ba0 = linear_init(keys[0], A_DIM, HID)
    wa1, ba1 = linear_init(keys[1], HID, HID)
    ws0, bs0 = linear_init(keys[2], S_DIM, HID)
    ws1, bs1 = linear_init(keys[3], HID, HID)
    wo0, bo0 = linear_init(keys[4], HID, HID)
    wo1, bo1 = linear_init(keys[5], HID, OUT)
    return (wa0, ba0, wa1, ba1, ws0, bs0, ws1, bs1, wo0, bo0, wo1, bo1)


def reference_forward(state, action, params):
    """Pure-JAX reference reproducing the PyTorch forward semantics."""
    (wa0, ba0, wa1, ba1, ws0, bs0, ws1, bs1, wo0, bo0, wo1, bo1) = params
    a = jnp.maximum(action @ wa0 + ba0, 0.0)
    a = jnp.maximum(a @ wa1 + ba1, 0.0)
    s = jnp.maximum(state @ ws0 + bs0, 0.0)
    s = jnp.maximum(s @ ws1 + bs1, 0.0)
    x = s + a
    x = jnp.maximum(x @ wo0 + bo0, 0.0)
    return x @ wo1 + bo1


if __name__ == "__main__":
    key = jax.random.PRNGKey(0)
    k_state, k_action, k_params = jax.random.split(key, 3)

    state = jax.random.normal(k_state, (BATCH, S_DIM), jnp.float32)
    action = jax.random.normal(k_action, (BATCH, A_DIM), jnp.float32)
    params = init_params(k_params)
    packed = pack_params(params)

    out = ac_critic_forward(state, action, packed)
    out = jax.block_until_ready(out)

    ref = reference_forward(state, action, params)
    assert out.shape == (BATCH, OUT), out.shape
    assert jnp.allclose(out, ref, atol=1e-4, rtol=1e-5), (out, ref)

    print("KERNEL_OK")
</pallas_src>

<mosaic_0001>
module attributes {stable_mosaic.version = 11 : i64} {
  func.func @critic_kernel(%arg0: i32, %arg1: memref<8x32xf32, #tpu.memory_space<vmem>>, %arg2: memref<8x16xf32, #tpu.memory_space<vmem>>, %arg3: memref<144x32xf32, #tpu.memory_space<vmem>>, %arg4: memref<8x32xf32, #tpu.memory_space<vmem>>, %arg5: memref<1x8xf32, #tpu.memory_space<vmem>>) attributes {dimension_semantics = [#tpu.dimension_semantics<parallel>], iteration_bounds = array<i64: 1>, scalar_prefetch = 0 : i64, scratch_operands = 0 : i64, tpu.core_type = #tpu.core_type<tc>, window_params = [{transform_indices = @transform_0, window_bounds = array<i64: 8, 32>}, {transform_indices = @transform_1, window_bounds = array<i64: 8, 16>}, {pipeline_mode = #tpu.pipeline_mode<synchronous>, transform_indices = @transform_2, window_bounds = array<i64: 144, 32>}, {pipeline_mode = #tpu.pipeline_mode<synchronous>, transform_indices = @transform_3, window_bounds = array<i64: 8, 32>}, {transform_indices = @transform_4, window_bounds = array<i64: 1, 8>}]} {
    %c0 = arith.constant 0 : index
    %c0_0 = arith.constant 0 : index
    %0 = vector.load %arg1[%c0, %c0_0] : memref<8x32xf32, #tpu.memory_space<vmem>>, vector<8x32xf32>
    %c0_1 = arith.constant 0 : index
    %c0_2 = arith.constant 0 : index
    %1 = vector.load %arg2[%c0_1, %c0_2] : memref<8x16xf32, #tpu.memory_space<vmem>>, vector<8x16xf32>
    %c0_3 = arith.constant 0 : index
    %c0_4 = arith.constant 0 : index
    %2 = vector.load %arg3[%c0_3, %c0_4] : memref<144x32xf32, #tpu.memory_space<vmem>>, vector<32x32xf32>
    %cst = arith.constant dense<0.000000e+00> : vector<8x32xf32>
    %3 = tpu.matmul %0, %2, %cst {dimension_numbers = #tpu.dot_dimension_numbers<[1], [0], [0], [1], [0, 0, 1, 1], [], []>} : vector<8x32xf32>, vector<32x32xf32>, vector<8x32xf32> -> vector<8x32xf32>
    %c0_5 = arith.constant 0 : index
    %c0_6 = arith.constant 0 : index
    %4 = vector.load %arg4[%c0_5, %c0_6] : memref<8x32xf32, #tpu.memory_space<vmem>>, vector<1x32xf32>
    %5 = vector.broadcast %4 : vector<1x32xf32> to vector<8x32xf32>
    %6 = arith.addf %3, %5 : vector<8x32xf32>
    %cst_7 = arith.constant 0.000000e+00 : f32
    %7 = vector.broadcast %cst_7 : f32 to vector<8x32xf32>
    %8 = arith.maximumf %6, %7 : vector<8x32xf32>
    %c48 = arith.constant 48 : index
    %c0_8 = arith.constant 0 : index
    %9 = vector.load %arg3[%c48, %c0_8] : memref<144x32xf32, #tpu.memory_space<vmem>>, vector<32x32xf32>
    %cst_9 = arith.constant dense<0.000000e+00> : vector<8x32xf32>
    %10 = tpu.matmul %8, %9, %cst_9 {dimension_numbers = #tpu.dot_dimension_numbers<[1], [0], [0], [1], [0, 0, 1, 1], [], []>} : vector<8x32xf32>, vector<32x32xf32>, vector<8x32xf32> -> vector<8x32xf32>
    %c2 = arith.constant 2 : index
    %c0_10 = arith.constant 0 : index
    %11 = vector.load %arg4[%c2, %c0_10] : memref<8x32xf32, #tpu.memory_space<vmem>>, vector<1x32xf32>
    %12 = vector.broadcast %11 : vector<1x32xf32> to vector<8x32xf32>
    %13 = arith.addf %10, %12 : vector<8x32xf32>
    %cst_11 = arith.constant 0.000000e+00 : f32
    %14 = vector.broadcast %cst_11 : f32 to vector<8x32xf32>
    %15 = arith.maximumf %13, %14 : vector<8x32xf32>
    %c32 = arith.constant 32 : index
    %c0_12 = arith.constant 0 : index
    %16 = vector.load %arg3[%c32, %c0_12] : memref<144x32xf32, #tpu.memory_space<vmem>>, vector<16x32xf32>
    %cst_13 = arith.constant dense<0.000000e+00> : vector<8x32xf32>
    %17 = tpu.matmul %1, %16, %cst_13 {dimension_numbers = #tpu.dot_dimension_numbers<[1], [0], [0], [1], [0, 0, 1, 1], [], []>} : vector<8x16xf32>, vector<16x32xf32>, vector<8x32xf32> -> vector<8x32xf32>
    %c1 = arith.constant 1 : index
    %c0_14 = arith.constant 0 : index
    %18 = vector.load %arg4[%c1, %c0_14] : memref<8x32xf32, #tpu.memory_space<vmem>>, vector<1x32xf32>
    %19 = vector.broadcast %18 : vector<1x32xf32> to vector<8x32xf32>
    %20 = arith.addf %17, %19 : vector<8x32xf32>
    %cst_15 = arith.constant 0.000000e+00 : f32
    %21 = vector.broadcast %cst_15 : f32 to vector<8x32xf32>
    %22 = arith.maximumf %20, %21 : vector<8x32xf32>
    %c80 = arith.constant 80 : index
    %c0_16 = arith.constant 0 : index
    %23 = vector.load %arg3[%c80, %c0_16] : memref<144x32xf32, #tpu.memory_space<vmem>>, vector<32x32xf32>
    %cst_17 = arith.constant dense<0.000000e+00> : vector<8x32xf32>
    %24 = tpu.matmul %22, %23, %cst_17 {dimension_numbers = #tpu.dot_dimension_numbers<[1], [0], [0], [1], [0, 0, 1, 1], [], []>} : vector<8x32xf32>, vector<32x32xf32>, vector<8x32xf32> -> vector<8x32xf32>
    %c3 = arith.constant 3 : index
    %c0_18 = arith.constant 0 : index
    %25 = vector.load %arg4[%c3, %c0_18] : memref<8x32xf32, #tpu.memory_space<vmem>>, vector<1x32xf32>
    %26 = vector.broadcast %25 : vector<1x32xf32> to vector<8x32xf32>
    %27 = arith.addf %24, %26 : vector<8x32xf32>
    %cst_19 = arith.constant 0.000000e+00 : f32
    %28 = vector.broadcast %cst_19 : f32 to vector<8x32xf32>
    %29 = arith.maximumf %27, %28 : vector<8x32xf32>
    %30 = arith.addf %15, %29 : vector<8x32xf32>
    %c112 = arith.constant 112 : index
    %c0_20 = arith.constant 0 : index
    %31 = vector.load %arg3[%c112, %c0_20] : memref<144x32xf32, #tpu.memory_space<vmem>>, vector<32x32xf32>
    %cst_21 = arith.constant dense<0.000000e+00> : vector<8x32xf32>
    %32 = tpu.matmul %30, %31, %cst_21 {dimension_numbers = #tpu.dot_dimension_numbers<[1], [0], [0], [1], [0, 0, 1, 1], [], []>} : vector<8x32xf32>, vector<32x32xf32>, vector<8x32xf32> -> vector<8x32xf32>
    %c4 = arith.constant 4 : index
    %c0_22 = arith.constant 0 : index
    %33 = vector.load %arg4[%c4, %c0_22] : memref<8x32xf32, #tpu.memory_space<vmem>>, vector<1x32xf32>
    %34 = vector.broadcast %33 : vector<1x32xf32> to vector<8x32xf32>
    %35 = arith.addf %32, %34 : vector<8x32xf32>
    %cst_23 = arith.constant 0.000000e+00 : f32
    %36 = vector.broadcast %cst_23 : f32 to vector<8x32xf32>
    %37 = arith.maximumf %35, %36 : vector<8x32xf32>
    %c5 = arith.constant 5 : index
    %c0_24 = arith.constant 0 : index
    %38 = vector.load %arg4[%c5, %c0_24] : memref<8x32xf32, #tpu.memory_space<vmem>>, vector<1x32xf32>
    %cst_25 = arith.constant dense<0.000000e+00> : vector<1x8xf32>
    %39 = tpu.matmul %38, %37, %cst_25 {dimension_numbers = #tpu.dot_dimension_numbers<[1], [1], [0], [0], [0, 0, 1, 0], [], []>} : vector<1x32xf32>, vector<8x32xf32>, vector<1x8xf32> -> vector<1x8xf32>
    %c6 = arith.constant 6 : index
    %c0_26 = arith.constant 0 : index
    %40 = vector.load %arg4[%c6, %c0_26] : memref<8x32xf32, #tpu.memory_space<vmem>>, vector<1x1xf32>
    %41 = vector.broadcast %40 : vector<1x1xf32> to vector<1x8xf32>
    %42 = arith.addf %39, %41 : vector<1x8xf32>
    %c0_27 = arith.constant 0 : index
    %c0_28 = arith.constant 0 : index
    %43 = vector.load %arg5[%c0_27, %c0_28] : memref<1x8xf32, #tpu.memory_space<vmem>>, vector<1x8xf32>
    tpu.vector_store %arg5[%c0_27, %c0_28], %42 {strides = array<i32>} : memref<1x8xf32, #tpu.memory_space<vmem>>, vector<1x8xf32>,
    return
  }
  func.func @transform_0(%arg0: i32) -> (i32, i32) {
    %c0_i32 = arith.constant 0 : i32
    %c0_i32_0 = arith.constant 0 : i32
    return %arg0, %c0_i32 : i32, i32
  }
  func.func @transform_1(%arg0: i32) -> (i32, i32) {
    %c0_i32 = arith.constant 0 : i32
    %c0_i32_0 = arith.constant 0 : i32
    return %arg0, %c0_i32 : i32, i32
  }
  func.func @transform_2(%arg0: i32) -> (i32, i32) {
    %c0_i32 = arith.constant 0 : i32
    %c0_i32_0 = arith.constant 0 : i32
    %c0_i32_1 = arith.constant 0 : i32
    return %c0_i32, %c0_i32_0 : i32, i32
  }
  func.func @transform_3(%arg0: i32) -> (i32, i32) {
    %c0_i32 = arith.constant 0 : i32
    %c0_i32_0 = arith.constant 0 : i32
    %c0_i32_1 = arith.constant 0 : i32
    return %c0_i32, %c0_i32_0 : i32, i32
  }
  func.func @transform_4(%arg0: i32) -> (i32, i32) {
    %c0_i32 = arith.constant 0 : i32
    %c0_i32_0 = arith.constant 0 : i32
    return %arg0, %c0_i32 : i32, i32
  }
}

</mosaic_0001>

<bundles_post_ra>
// kernel: tpu_custom_call.1
= control target key start
LH: loop header
LB: loop body
LE: loop exit
PB: predicated region body
PF: predicated region fallthrough
CT: control target
= control target key end

     0   :  { %v655_v1 = vmov 0.0   ;;  %vm656_vm0 = vmmov 0   ;;  %s805_s0 = inlined_call_operand.vmem [shape: f32[8,32], index: 0, kind: input, shape index: {}]   ;;  %s806_s1 = inlined_call_operand.vmem [shape: f32[8,16], index: 1, kind: input, shape index: {}]   ;;  %s807_s2 = inlined_call_operand.vmem [shape: f32[144,32], index: 2, kind: input, shape index: {}]   ;;  %s808_s3 = inlined_call_operand.vmem [shape: f32[8,32], index: 3, kind: input, shape index: {}]   ;;  %s809_s4 = inlined_call_operand.hbm [shape: f32[1,8], index: 4, kind: output, shape index: {}]  }
   0x1   :  { %v23_v0 = vld [vmem:[%s807_s2 + $0x18] sm:$0xff]  ;;  %572 = vmatprep.subr.mxu0 %v655_v1  ;;  %v22_v2 = vld [vmem:[%s807_s2 + $0x10] sm:$0xff]  ;;  %580 = vmatprep.mubr.msk.f32.mxu0 %vm656_vm0, %v655_v1  ;;  %v107_v3 = vld [vmem:[%s807_s2 + $0x48] sm:$0xff] }
   0x2   :  { %573 = vmatpush3.msra.mxu0 %v23_v0  ;;  %583 = vmatprep.subr.mxu1 %v655_v1  ;;  %v21_v4 = vld [vmem:[%s807_s2 + $0x8] sm:$0xff]  ;;  %v106_v5 = vld [vmem:[%s807_s2 + $0x40] sm:$0xff] }
   0x3   :  { %574 = vmatprep.subr.mxu0 %v655_v1  ;;  %584 = vmatpush3.msra.mxu1 %v107_v3 }
   0x4   :  { %9 = vsyncpa [#allocation3], 0  ;;  %575 = vmatpush3.msra.mxu0 %v22_v2  ;;  %585 = vmatprep.subr.mxu1 %v655_v1  ;;  %v20_v6 = vld [vmem:[%s807_s2] sm:$0xff]  ;;  %vm29_vm1 = vcmask 261120   ;;  %v188_v8 = vld [vmem:[%s807_s2 + $0x28] sm:$0xff]  ;;  %vm194_vm2 = vcmask 130048  }
   0x5   :  { %576 = vmatprep.subr.mxu0 %v655_v1  ;;  %586 = vmatpush3.msra.mxu1 %v106_v5  ;;  %v18_v7 = vld [vmem:[%s805_s0] sm:$0xff]  ;;  %v105_v11 = vld [vmem:[%s807_s2 + $0x38] sm:$0xff]  ;;  %v104_v12 = vld [vmem:[%s807_s2 + $0x30] sm:$0xff]  ;;  %v657_v43 = vmov 0   ;;  %s658_s12 = smov [#allocation2]   ;;  %vm519_vm3 = vcmask 57344  }
   0x6   :  { %577 = vmatpush3.msra.mxu0 %v21_v4  ;;  %587 = vmatprep.subr.mxu1 %v655_v1  ;;  %v187_v9 = vld [vmem:[%s807_s2 + $0x20] sm:$0xff]  ;;  %v272_v19 = vld [vmem:[%s807_s2 + $0x68] sm:$0xff]  ;;  %v270_v24 = vld [vmem:[%s807_s2 + $0x58] sm:$0xff]  ;;  %s527_s13 = sshll.u32 %s658_s12, 4  ;;  %s528_s13 = int_to_ptr.vmem [resolvable:$true] %s527_s13 }
   0x7   :  { %578 = vmatprep.subr.mxu0 %v655_v1  ;;  %591 = vmatprep.mubr.msk.f32.mxu1 %vm656_vm0, %v655_v1  ;;  %v19_v10 = vld [vmem:[%s806_s1] sm:$0xff]  ;;  %v269_v26 = vld [vmem:[%s807_s2 + $0x50] sm:$0xff]  ;;  %v356_v27 = vld [vmem:[%s807_s2 + $0x88] sm:$0xff]  ;;  %s633_s14 = scalar_lea.vmem %s528_s13, 16  ;;  %s637_s15 = scalar_lea.vmem %s528_s13, 32 }
   0x8   :  { %579 = vmatpush3.msra.mxu0 %v20_v6  ;;  %588 = vmatpush3.msra.mxu1 %v105_v11  ;;  %v535_v13 = vld [vmem:[%s808_s3] ss:$0 sm:$0xff]  ;;  %v539_v17 = vld [vmem:[%s808_s3 + $0x1] ss:$0 sm:$0xff]  ;;  %v354_v29 = vld [vmem:[%s807_s2 + $0x78] sm:$0xff]  ;;  %p634_p0 = scmp.ne.s32.totalorder %s528_s13, %s633_s14  ;;  %p638_p1 = scmp.lt.s32.totalorder %s528_s13, %s528_s13 }
   0x9   :  { %581 = vmatmul.mubr.msk.f32.vlgmr.msra.gmra.mxu0 %vm29_vm1, %v18_v7  ;;  %594 = vmatprep.subr.mxu0 %v655_v1  ;;  %v271_v22 = vld [vmem:[%s807_s2 + $0x60] sm:$0xff]  ;;  %v353_v30 = vld [vmem:[%s807_s2 + $0x70] sm:$0xff]  ;;  %p639_p2 = scmp.lt.s32.totalorder %s637_s15, %s633_s14 }
   0xa   :  { %595 = vmatpush3.msra.mxu0 %v188_v8  ;;  %598 = vmatprep.mubr.msk.f32.mxu0 %vm656_vm0, %v655_v1  ;;  %v355_v28 = vld [vmem:[%s807_s2 + $0x80] sm:$0xff] }
   0xb   :  { %596 = vmatprep.subr.mxu0 %v655_v1  ;;  %589 = vmatprep.subr.mxu1 %v655_v1  ;;  %v537_v33 = vld [vmem:[%s808_s3 + $0x2] ss:$0 sm:$0xff]  ;;  %v541_v34 = vld [vmem:[%s808_s3 + $0x3] ss:$0 sm:$0xff]  ;;  %v437_v42 = vld [vmem:[%s808_s3 + $0x6] sm:$0x1]  ;;  %p640_p3 = por %p639_p2, %p638_p1 }
   0xc   :  { %597 = vmatpush3.msra.mxu0 %v187_v9  ;;  %590 = vmatpush3.msra.mxu1 %v104_v12  ;;  %v543_v44 = vld [vmem:[%s808_s3 + $0x4] ss:$0 sm:$0xff]  ;;  %v436_v49 = vld [vmem:[%s808_s3 + $0x5] sm:$0x1] }
   0xd   :  { %599 = vmatmul.mubr.msk.f32.vlgmr.msra.gmra.mxu0 %vm194_vm2, %v19_v10  ;;  %612 = vmatprep.subr.mxu0 %v655_v1  ;;  %p641_p4 = pnand %p640_p3, %p634_p0 }
   0xe   :  { %620 = vmatprep.mubr.msk.f32.mxu0 %vm656_vm0, %v655_v1  ;;  %601 = vmatprep.subr.mxu1 %v655_v1 }
   0xf   :  { %613 = vmatpush3.msra.mxu0 %v356_v27  ;;  %632 = vset.pattern.permute.xlu0 %v657_v43 }
  0x10   :  { %614 = vmatprep.subr.mxu0 %v655_v1  ;;  %440 = vperm.xlu0 %632, %v437_v42  }
  0x11   :  { %615 = vmatpush3.msra.mxu0 %v355_v28 }
  0x12   :  { %616 = vmatprep.subr.mxu0 %v655_v1 }
  0x13   :  { %617 = vmatpush3.msra.mxu0 %v354_v29 }
  0x14   :  { %618 = vmatprep.subr.mxu0 %v655_v1 }
  0x15   :  { %619 = vmatpush3.msra.mxu0 %v353_v30 }
  0x8b   :  { %v441_v50 = vpop.permute.xlu0 %440 }
  0xc9   :  { %v99_v14 = vpop.f32.mrf.mxu0 }
  0xca   :  { %v100_v15 = vadd.f32 %v535_v13, %v99_v14 }
  0xcb   :  { %v582_v16 = vpop.f32.mrf.mxu0 }
  0xcc   :  { %v103_v18 = vmax.f32 %v100_v15, 0.0 }
  0xcd   :  { %v264_v20 = vpop.f32.mrf.mxu0 }
  0xce   :  { %592 = vmatmul.mubr.msk.f32.vlgmr.msra.gmra.mxu1 %vm29_vm1, %v103_v18  ;;  %v265_v21 = vadd.f32 %v539_v17, %v264_v20 }
  0xcf   :  { %602 = vmatpush3.msra.mxu1 %v272_v19  ;;  %v600_v23 = vpop.f32.mrf.mxu0  ;;  %609 = vmatprep.mubr.msk.f32.mxu1 %vm656_vm0, %v655_v1 }
  0xd0   :  { %603 = vmatprep.subr.mxu1 %v655_v1  ;;  %v268_v25 = vmax.f32 %v265_v21, 0.0 }
  0xd1   :  { %604 = vmatpush3.msra.mxu1 %v271_v22 }
  0xd2   :  { %605 = vmatprep.subr.mxu1 %v655_v1 }
  0xd3   :  { %606 = vmatpush3.msra.mxu1 %v270_v24 }
  0xd4   :  { %607 = vmatprep.subr.mxu1 %v655_v1 }
  0xd5   :  { %608 = vmatpush3.msra.mxu1 %v269_v26 }
  0xd6   :  { %610 = vmatmul.mubr.msk.f32.vlgmr.msra.gmra.mxu1 %vm29_vm1, %v268_v25  ;;  %623 = vmatprep.subr.mxu1 %v655_v1 }
  0xd7   :  { %625 = vmatprep.mubr.msk.f32.mxu1 %vm656_vm0, %v655_v1 }
 0x18e   :  { %v182_v31 = vpop.f32.mrf.mxu1 }
 0x18f   :  { %v183_v35 = vadd.f32 %v537_v33, %v182_v31 }
 0x190   :  { %v593_v32 = vpop.f32.mrf.mxu1 }
 0x191   :  { %v186_v39 = vmax.f32 %v183_v35, 0.0 }
 0x196   :  { %v347_v36 = vpop.f32.mrf.mxu1 }
 0x197   :  { %v348_v37 = vadd.f32 %v541_v34, %v347_v36 }
 0x198   :  { %v611_v38 = vpop.f32.mrf.mxu1 }
 0x199   :  { %v351_v40 = vmax.f32 %v348_v37, 0.0 }
 0x19b   :  { %v352_v41 = vadd.f32 %v351_v40, %v186_v39 }
 0x19d   :  { %621 = vmatmul.mubr.msk.f32.vlgmr.msra.gmra.mxu0 %vm29_vm1, %v352_v41 }
 0x25d   :  { %v431_v45 = vpop.f32.mrf.mxu0 }
 0x25e   :  { %v432_v46 = vadd.f32 %v543_v44, %v431_v45 }
 0x25f   :  { %v622_v47 = vpop.f32.mrf.mxu0 }
 0x260   :  { %v435_v48 = vmax.f32 %v432_v46, 0.0 }
 0x262   :  { %624 = vmatpush3.xpose.msk.msra.mxu1 %vm29_vm1, %v435_v48 }
 0x265   :  { %626 = vmatmul.mubr.msk.f32.vlgmr.msra.gmra.mxu1 %vm29_vm1, %v436_v49 }
 0x325   :  { %v515_v51 = vpop.f32.mrf.mxu1 }
 0x326   :  { %v516_v52 = vadd.f32 %v515_v51, %v441_v50 }
 0x327   :  { %v627_v53 = vpop.f32.mrf.mxu1 }
 0x328   :  { %520 = vst.msk [vmem:[#allocation2] sm:$0x1] %vm519_vm3, %v516_v52 }
 0x329   :  { %644 = shalt.err (!%p641_p4)
}
 0x32a   :  { %530 = dma.vmem_to_hbm [thread:$0]  %s528_s13, 16, %s809_s4, [#allocation3]  }
 0x32b   :  { %653 = dma.done.wait [#allocation3], 16  }
 0x32c   :  { %654 = vsyncadd [#allocation3], 4294967280 }
 0x32d   :  { %534 = vsyncpa [#allocation3], 1 }

</bundles_post_ra>
